<compile_context>
chip_gen: v6e
topology: v6e:2x2x1
jax: 0.10.0
libtpu: 0.0.40
codegen_flags: <defaults>
</compile_context>

<pallas_src>
import numpy as np
import jax
import jax.numpy as jnp
from jax import lax
from jax.experimental import pallas as pl
from jax.experimental.pallas import tpu as pltpu


_TAPS = tuple((dy, dx) for dy in (-1, 0, 1) for dx in (-1, 0, 1))


def _make_kernel(C, H, W):
    HW = H * W

    def _conv3x3(act, w_ref, b_ref, mask_ref, col_ref):
        # act: (C, HW) f32 activation (already relu'd).
        # Build the im2col matrix in `col_ref` ((9*C, HW) VMEM scratch) with
        # lane rolls + border masks, then one MXU matmul with K = 9*C.
        for k, (dy, dx) in enumerate(_TAPS):
            shift = (-(dy * W + dx)) % HW          # tap[p] = act[p + dy*W + dx]
            tap = act if shift == 0 else pltpu.roll(act, shift, axis=1)
            if dy != 0 or dx != 0:
                tap = tap * mask_ref[k]            # (1, HW) zero-pad border mask
            col_ref[k * C:(k + 1) * C, :] = tap
        out = jnp.dot(w_ref[...], col_ref[...],
                      preferred_element_type=jnp.float32)    # (C, HW)
        return out + b_ref[...]                              # bias (C, 1)

    def kernel(x_ref, w1_ref, b1_ref, w2_ref, b2_ref, mask_ref,
               out_ref, col_ref):
        x = x_ref[0].astype(jnp.float32)                     # (C, HW)
        h1 = _conv3x3(jnp.maximum(x, 0.0), w1_ref, b1_ref, mask_ref, col_ref)
        h2 = _conv3x3(jnp.maximum(h1, 0.0), w2_ref, b2_ref, mask_ref, col_ref)
        out_ref[0] = (h2 + x).astype(out_ref.dtype)          # residual add

    return kernel


def _shift_masks(H, W):
    # mask[k, 0, y*W + x] == 1 iff source pixel (y+dy, x+dx) lies inside the
    # image for tap k = (dy+1)*3 + (dx+1)   (zero padding => masked-out taps).
    ys = np.arange(H)[:, None]
    xs = np.arange(W)[None, :]
    rows = []
    for dy, dx in _TAPS:
        valid = ((ys + dy >= 0) & (ys + dy < H) &
                 (xs + dx >= 0) & (xs + dx < W))
        rows.append(valid.astype(np.float32).reshape(1, H * W))
    return jnp.asarray(np.stack(rows, axis=0))               # (9, 1, H*W)


def residual_block_nchw(x_nchw, w1, b1, w2, b2):
    """Matches PyTorch ResidualBlock.forward.

    x_nchw: (N, C, H, W) float32
    w1, w2: (C, C, 3, 3) OIHW (PyTorch conv layout); b1, b2: (C,)
    """
    N, C, H, W = x_nchw.shape
    HW = H * W

    x_flat = x_nchw.reshape(N, C, HW)                         # free reshape
    # (C_out, C_in, ky, kx) -> (C_out, 9*C_in); column index = (ky*3+kx)*C + ci
    # which matches the im2col row ordering built in the kernel.
    w1c = jnp.transpose(w1, (0, 2, 3, 1)).reshape(C, 9 * C)
    w2c = jnp.transpose(w2, (0, 2, 3, 1)).reshape(C, 9 * C)
    b1c = b1.reshape(C, 1).astype(jnp.float32)
    b2c = b2.reshape(C, 1).astype(jnp.float32)
    mask = _shift_masks(H, W)

    kernel = _make_kernel(C, H, W)
    const2 = lambda n: (0, 0)
    const3 = lambda n: (0, 0, 0)

    y_flat = pl.pallas_call(
        kernel,
        out_shape=jax.ShapeDtypeStruct((N, C, HW), x_nchw.dtype),
        grid_spec=pltpu.PrefetchScalarGridSpec(
            num_scalar_prefetch=0,
            grid=(N,),
            in_specs=[
                pl.BlockSpec((1, C, HW), lambda n: (n, 0, 0)),   # x
                pl.BlockSpec((C, 9 * C), const2),                # w1 (C, 9C)
                pl.BlockSpec((C, 1), const2),                    # b1 (C, 1)
                pl.BlockSpec((C, 9 * C), const2),                # w2
                pl.BlockSpec((C, 1), const2),                    # b2
                pl.BlockSpec((9, 1, HW), const3),                # border masks
            ],
            out_specs=pl.BlockSpec((1, C, HW), lambda n: (n, 0, 0)),
            scratch_shapes=[pltpu.VMEM((9 * C, HW), jnp.float32)],  # im2col
        ),
        compiler_params=pltpu.CompilerParams(
            dimension_semantics=("parallel",)),
    )(x_flat, w1c, b1c, w2c, b2c, mask)

    return y_flat.reshape(N, C, H, W)


def _reference_nchw(x, w1, b1, w2, b2):
    """Plain-JAX reference (lax conv), NCHW/OIHW -- mirrors the PyTorch module."""
    dn = lax.conv_dimension_numbers(x.shape, w1.shape, ("NCHW", "OIHW", "NCHW"))

    def conv(a, w, b):
        y = lax.conv_general_dilated(a, w, window_strides=(1, 1),
                                     padding="SAME", dimension_numbers=dn)
        return y + b[None, :, None, None]

    out = conv(jnp.maximum(x, 0.0), w1, b1)
    out = conv(jnp.maximum(out, 0.0), w2, b2)
    return out + x


def _init_params(key, n_channels):
    """Deterministic init mimicking PyTorch Conv2d defaults (OIHW layout)."""
    fan_in = n_channels * 3 * 3
    bound = 1.0 / float(np.sqrt(fan_in))
    k1, k2, k3, k4 = jax.random.split(key, 4)
    w1 = jax.random.uniform(k1, (n_channels, n_channels, 3, 3),
                            jnp.float32, -bound, bound)
    b1 = jax.random.uniform(k2, (n_channels,), jnp.float32, -bound, bound)
    w2 = jax.random.uniform(k3, (n_channels, n_channels, 3, 3),
                            jnp.float32, -bound, bound)
    b2 = jax.random.uniform(k4, (n_channels,), jnp.float32, -bound, bound)
    return w1, b1, w2, b2


if __name__ == "__main__":
    N, C, H, W = 2, 4, 16, 16
    key = jax.random.PRNGKey(0)
    kx, kp = jax.random.split(key)
    x = jax.random.normal(kx, (N, C, H, W), jnp.float32)
    w1, b1, w2, b2 = _init_params(kp, C)

    out = residual_block_nchw(x, w1, b1, w2, b2)
    out = jax.block_until_ready(out)

    # correctness check vs plain-JAX reference
    ref = _reference_nchw(x, w1, b1, w2, b2)
    assert out.shape == (N, C, H, W)
    err = float(jnp.max(jnp.abs(out - ref)))
    assert jnp.allclose(out, ref, atol=1e-4, rtol=1e-4), err

    print("KERNEL_OK")
</pallas_src>

<mosaic_0001>
module attributes {stable_mosaic.version = 11 : i64} {
  func.func @kernel(%arg0: i32, %arg1: memref<1x4x256xf32, #tpu.memory_space<vmem>>, %arg2: memref<4x36xf32, #tpu.memory_space<vmem>>, %arg3: memref<4x1xf32, #tpu.memory_space<vmem>>, %arg4: memref<4x36xf32, #tpu.memory_space<vmem>>, %arg5: memref<4x1xf32, #tpu.memory_space<vmem>>, %arg6: memref<9x1x256xf32, #tpu.memory_space<vmem>>, %arg7: memref<1x4x256xf32, #tpu.memory_space<vmem>>, %arg8: memref<36x256xf32, #tpu.memory_space<vmem>>) attributes {dimension_semantics = [#tpu.dimension_semantics<parallel>], iteration_bounds = array<i64: 2>, scalar_prefetch = 0 : i64, scratch_operands = 1 : i64, tpu.core_type = #tpu.core_type<tc>, window_params = [{transform_indices = @transform_0, window_bounds = array<i64: 1, 4, 256>}, {pipeline_mode = #tpu.pipeline_mode<synchronous>, transform_indices = @transform_1, window_bounds = array<i64: 4, 36>}, {pipeline_mode = #tpu.pipeline_mode<synchronous>, transform_indices = @transform_2, window_bounds = array<i64: 4, 1>}, {pipeline_mode = #tpu.pipeline_mode<synchronous>, transform_indices = @transform_3, window_bounds = array<i64: 4, 36>}, {pipeline_mode = #tpu.pipeline_mode<synchronous>, transform_indices = @transform_4, window_bounds = array<i64: 4, 1>}, {pipeline_mode = #tpu.pipeline_mode<synchronous>, transform_indices = @transform_5, window_bounds = array<i64: 9, 1, 256>}, {transform_indices = @transform_6, window_bounds = array<i64: 1, 4, 256>}]} {
    %c0 = arith.constant 0 : index
    %c0_0 = arith.constant 0 : index
    %c0_1 = arith.constant 0 : index
    %0 = vector.load %arg1[%c0, %c0_0, %c0_1] : memref<1x4x256xf32, #tpu.memory_space<vmem>>, vector<1x4x256xf32>
    %1 = vector.shape_cast %0 : vector<1x4x256xf32> to vector<4x256xf32>
    %cst = arith.constant 0.000000e+00 : f32
    %2 = vector.broadcast %cst : f32 to vector<4x256xf32>
    %3 = arith.maximumf %1, %2 : vector<4x256xf32>
    %c17_i32 = arith.constant 17 : i32
    %4 = tpu.dynamic_rotate %3 by %c17_i32 dim 1 : vector<4x256xf32>, i32 -> vector<4x256xf32>
    %c0_2 = arith.constant 0 : index
    %c0_3 = arith.constant 0 : index
    %c0_4 = arith.constant 0 : index
    %5 = vector.load %arg6[%c0_2, %c0_3, %c0_4] : memref<9x1x256xf32, #tpu.memory_space<vmem>>, vector<1x1x256xf32>
    %6 = vector.shape_cast %5 : vector<1x1x256xf32> to vector<1x256xf32>
    %7 = vector.broadcast %6 : vector<1x256xf32> to vector<4x256xf32>
    %8 = arith.mulf %4, %7 : vector<4x256xf32>
    %c0_5 = arith.constant 0 : index
    %c0_6 = arith.constant 0 : index
    %9 = vector.load %arg8[%c0_5, %c0_6] : memref<36x256xf32, #tpu.memory_space<vmem>>, vector<4x256xf32>
    tpu.vector_store %arg8[%c0_5, %c0_6], %8 {strides = array<i32>} : memref<36x256xf32, #tpu.memory_space<vmem>>, vector<4x256xf32>,
    %c16_i32 = arith.constant 16 : i32
    %10 = tpu.dynamic_rotate %3 by %c16_i32 dim 1 : vector<4x256xf32>, i32 -> vector<4x256xf32>
    %c1 = arith.constant 1 : index
    %c0_7 = arith.constant 0 : index
    %c0_8 = arith.constant 0 : index
    %11 = vector.load %arg6[%c1, %c0_7, %c0_8] : memref<9x1x256xf32, #tpu.memory_space<vmem>>, vector<1x1x256xf32>
    %12 = vector.shape_cast %11 : vector<1x1x256xf32> to vector<1x256xf32>
    %13 = vector.broadcast %12 : vector<1x256xf32> to vector<4x256xf32>
    %14 = arith.mulf %10, %13 : vector<4x256xf32>
    %c4 = arith.constant 4 : index
    %c0_9 = arith.constant 0 : index
    %15 = vector.load %arg8[%c4, %c0_9] : memref<36x256xf32, #tpu.memory_space<vmem>>, vector<4x256xf32>
    tpu.vector_store %arg8[%c4, %c0_9], %14 {strides = array<i32>} : memref<36x256xf32, #tpu.memory_space<vmem>>, vector<4x256xf32>,
    %c15_i32 = arith.constant 15 : i32
    %16 = tpu.dynamic_rotate %3 by %c15_i32 dim 1 : vector<4x256xf32>, i32 -> vector<4x256xf32>
    %c2 = arith.constant 2 : index
    %c0_10 = arith.constant 0 : index
    %c0_11 = arith.constant 0 : index
    %17 = vector.load %arg6[%c2, %c0_10, %c0_11] : memref<9x1x256xf32, #tpu.memory_space<vmem>>, vector<1x1x256xf32>
    %18 = vector.shape_cast %17 : vector<1x1x256xf32> to vector<1x256xf32>
    %19 = vector.broadcast %18 : vector<1x256xf32> to vector<4x256xf32>
    %20 = arith.mulf %16, %19 : vector<4x256xf32>
    %c8 = arith.constant 8 : index
    %c0_12 = arith.constant 0 : index
    %21 = vector.load %arg8[%c8, %c0_12] : memref<36x256xf32, #tpu.memory_space<vmem>>, vector<4x256xf32>
    tpu.vector_store %arg8[%c8, %c0_12], %20 {strides = array<i32>} : memref<36x256xf32, #tpu.memory_space<vmem>>, vector<4x256xf32>,
    %c1_i32 = arith.constant 1 : i32
    %22 = tpu.dynamic_rotate %3 by %c1_i32 dim 1 : vector<4x256xf32>, i32 -> vector<4x256xf32>
    %c3 = arith.constant 3 : index
    %c0_13 = arith.constant 0 : index
    %c0_14 = arith.constant 0 : index
    %23 = vector.load %arg6[%c3, %c0_13, %c0_14] : memref<9x1x256xf32, #tpu.memory_space<vmem>>, vector<1x1x256xf32>
    %24 = vector.shape_cast %23 : vector<1x1x256xf32> to vector<1x256xf32>
    %25 = vector.broadcast %24 : vector<1x256xf32> to vector<4x256xf32>
    %26 = arith.mulf %22, %25 : vector<4x256xf32>
    %c12 = arith.constant 12 : index
    %c0_15 = arith.constant 0 : index
    %27 = vector.load %arg8[%c12, %c0_15] : memref<36x256xf32, #tpu.memory_space<vmem>>, vector<4x256xf32>
    tpu.vector_store %arg8[%c12, %c0_15], %26 {strides = array<i32>} : memref<36x256xf32, #tpu.memory_space<vmem>>, vector<4x256xf32>,
    %c16 = arith.constant 16 : index
    %c0_16 = arith.constant 0 : index
    %28 = vector.load %arg8[%c16, %c0_16] : memref<36x256xf32, #tpu.memory_space<vmem>>, vector<4x256xf32>
    tpu.vector_store %arg8[%c16, %c0_16], %3 {strides = array<i32>} : memref<36x256xf32, #tpu.memory_space<vmem>>, vector<4x256xf32>,
    %c255_i32 = arith.constant 255 : i32
    %29 = tpu.dynamic_rotate %3 by %c255_i32 dim 1 : vector<4x256xf32>, i32 -> vector<4x256xf32>
    %c5 = arith.constant 5 : index
    %c0_17 = arith.constant 0 : index
    %c0_18 = arith.constant 0 : index
    %30 = vector.load %arg6[%c5, %c0_17, %c0_18] : memref<9x1x256xf32, #tpu.memory_space<vmem>>, vector<1x1x256xf32>
    %31 = vector.shape_cast %30 : vector<1x1x256xf32> to vector<1x256xf32>
    %32 = vector.broadcast %31 : vector<1x256xf32> to vector<4x256xf32>
    %33 = arith.mulf %29, %32 : vector<4x256xf32>
    %c20 = arith.constant 20 : index
    %c0_19 = arith.constant 0 : index
    %34 = vector.load %arg8[%c20, %c0_19] : memref<36x256xf32, #tpu.memory_space<vmem>>, vector<4x256xf32>
    tpu.vector_store %arg8[%c20, %c0_19], %33 {strides = array<i32>} : memref<36x256xf32, #tpu.memory_space<vmem>>, vector<4x256xf32>,
    %c241_i32 = arith.constant 241 : i32
    %35 = tpu.dynamic_rotate %3 by %c241_i32 dim 1 : vector<4x256xf32>, i32 -> vector<4x256xf32>
    %c6 = arith.constant 6 : index
    %c0_20 = arith.constant 0 : index
    %c0_21 = arith.constant 0 : index
    %36 = vector.load %arg6[%c6, %c0_20, %c0_21] : memref<9x1x256xf32, #tpu.memory_space<vmem>>, vector<1x1x256xf32>
    %37 = vector.shape_cast %36 : vector<1x1x256xf32> to vector<1x256xf32>
    %38 = vector.broadcast %37 : vector<1x256xf32> to vector<4x256xf32>
    %39 = arith.mulf %35, %38 : vector<4x256xf32>
    %c24 = arith.constant 24 : index
    %c0_22 = arith.constant 0 : index
    %40 = vector.load %arg8[%c24, %c0_22] : memref<36x256xf32, #tpu.memory_space<vmem>>, vector<4x256xf32>
    tpu.vector_store %arg8[%c24, %c0_22], %39 {strides = array<i32>} : memref<36x256xf32, #tpu.memory_space<vmem>>, vector<4x256xf32>,
    %c240_i32 = arith.constant 240 : i32
    %41 = tpu.dynamic_rotate %3 by %c240_i32 dim 1 : vector<4x256xf32>, i32 -> vector<4x256xf32>
    %c7 = arith.constant 7 : index
    %c0_23 = arith.constant 0 : index
    %c0_24 = arith.constant 0 : index
    %42 = vector.load %arg6[%c7, %c0_23, %c0_24] : memref<9x1x256xf32, #tpu.memory_space<vmem>>, vector<1x1x256xf32>
    %43 = vector.shape_cast %42 : vector<1x1x256xf32> to vector<1x256xf32>
    %44 = vector.broadcast %43 : vector<1x256xf32> to vector<4x256xf32>
    %45 = arith.mulf %41, %44 : vector<4x256xf32>
    %c28 = arith.constant 28 : index
    %c0_25 = arith.constant 0 : index
    %46 = vector.load %arg8[%c28, %c0_25] : memref<36x256xf32, #tpu.memory_space<vmem>>, vector<4x256xf32>
    tpu.vector_store %arg8[%c28, %c0_25], %45 {strides = array<i32>} : memref<36x256xf32, #tpu.memory_space<vmem>>, vector<4x256xf32>,
    %c239_i32 = arith.constant 239 : i32
    %47 = tpu.dynamic_rotate %3 by %c239_i32 dim 1 : vector<4x256xf32>, i32 -> vector<4x256xf32>
    %c8_26 = arith.constant 8 : index
    %c0_27 = arith.constant 0 : index
    %c0_28 = arith.constant 0 : index
    %48 = vector.load %arg6[%c8_26, %c0_27, %c0_28] : memref<9x1x256xf32, #tpu.memory_space<vmem>>, vector<1x1x256xf32>
    %49 = vector.shape_cast %48 : vector<1x1x256xf32> to vector<1x256xf32>
    %50 = vector.broadcast %49 : vector<1x256xf32> to vector<4x256xf32>
    %51 = arith.mulf %47, %50 : vector<4x256xf32>
    %c32 = arith.constant 32 : index
    %c0_29 = arith.constant 0 : index
    %52 = vector.load %arg8[%c32, %c0_29] : memref<36x256xf32, #tpu.memory_space<vmem>>, vector<4x256xf32>
    tpu.vector_store %arg8[%c32, %c0_29], %51 {strides = array<i32>} : memref<36x256xf32, #tpu.memory_space<vmem>>, vector<4x256xf32>,
    %c0_30 = arith.constant 0 : index
    %c0_31 = arith.constant 0 : index
    %53 = vector.load %arg2[%c0_30, %c0_31] : memref<4x36xf32, #tpu.memory_space<vmem>>, vector<4x36xf32>
    %c0_32 = arith.constant 0 : index
    %c0_33 = arith.constant 0 : index
    %54 = vector.load %arg8[%c0_32, %c0_33] : memref<36x256xf32, #tpu.memory_space<vmem>>, vector<36x256xf32>
    %cst_34 = arith.constant dense<0.000000e+00> : vector<4x256xf32>
    %55 = tpu.matmul %53, %54, %cst_34 {dimension_numbers = #tpu.dot_dimension_numbers<[1], [0], [0], [1], [0, 0, 1, 1], [], []>} : vector<4x36xf32>, vector<36x256xf32>, vector<4x256xf32> -> vector<4x256xf32>
    %c0_35 = arith.constant 0 : index
    %c0_36 = arith.constant 0 : index
    %56 = vector.load %arg3[%c0_35, %c0_36] : memref<4x1xf32, #tpu.memory_space<vmem>>, vector<4x1xf32>
    %57 = vector.broadcast %56 : vector<4x1xf32> to vector<4x256xf32>
    %58 = arith.addf %55, %57 : vector<4x256xf32>
    %cst_37 = arith.constant 0.000000e+00 : f32
    %59 = vector.broadcast %cst_37 : f32 to vector<4x256xf32>
    %60 = arith.maximumf %58, %59 : vector<4x256xf32>
    %c17_i32_38 = arith.constant 17 : i32
    %61 = tpu.dynamic_rotate %60 by %c17_i32_38 dim 1 : vector<4x256xf32>, i32 -> vector<4x256xf32>
    %c0_39 = arith.constant 0 : index
    %c0_40 = arith.constant 0 : index
    %c0_41 = arith.constant 0 : index
    %62 = vector.load %arg6[%c0_39, %c0_40, %c0_41] : memref<9x1x256xf32, #tpu.memory_space<vmem>>, vector<1x1x256xf32>
    %63 = vector.shape_cast %62 : vector<1x1x256xf32> to vector<1x256xf32>
    %64 = vector.broadcast %63 : vector<1x256xf32> to vector<4x256xf32>
    %65 = arith.mulf %61, %64 : vector<4x256xf32>
    %c0_42 = arith.constant 0 : index
    %c0_43 = arith.constant 0 : index
    %66 = vector.load %arg8[%c0_42, %c0_43] : memref<36x256xf32, #tpu.memory_space<vmem>>, vector<4x256xf32>
    tpu.vector_store %arg8[%c0_42, %c0_43], %65 {strides = array<i32>} : memref<36x256xf32, #tpu.memory_space<vmem>>, vector<4x256xf32>,
    %c16_i32_44 = arith.constant 16 : i32
    %67 = tpu.dynamic_rotate %60 by %c16_i32_44 dim 1 : vector<4x256xf32>, i32 -> vector<4x256xf32>
    %c1_45 = arith.constant 1 : index
    %c0_46 = arith.constant 0 : index
    %c0_47 = arith.constant 0 : index
    %68 = vector.load %arg6[%c1_45, %c0_46, %c0_47] : memref<9x1x256xf32, #tpu.memory_space<vmem>>, vector<1x1x256xf32>
    %69 = vector.shape_cast %68 : vector<1x1x256xf32> to vector<1x256xf32>
    %70 = vector.broadcast %69 : vector<1x256xf32> to vector<4x256xf32>
    %71 = arith.mulf %67, %70 : vector<4x256xf32>
    %c4_48 = arith.constant 4 : index
    %c0_49 = arith.constant 0 : index
    %72 = vector.load %arg8[%c4_48, %c0_49] : memref<36x256xf32, #tpu.memory_space<vmem>>, vector<4x256xf32>
    tpu.vector_store %arg8[%c4_48, %c0_49], %71 {strides = array<i32>} : memref<36x256xf32, #tpu.memory_space<vmem>>, vector<4x256xf32>,
    %c15_i32_50 = arith.constant 15 : i32
    %73 = tpu.dynamic_rotate %60 by %c15_i32_50 dim 1 : vector<4x256xf32>, i32 -> vector<4x256xf32>
    %c2_51 = arith.constant 2 : index
    %c0_52 = arith.constant 0 : index
    %c0_53 = arith.constant 0 : index
    %74 = vector.load %arg6[%c2_51, %c0_52, %c0_53] : memref<9x1x256xf32, #tpu.memory_space<vmem>>, vector<1x1x256xf32>
    %75 = vector.shape_cast %74 : vector<1x1x256xf32> to vector<1x256xf32>
    %76 = vector.broadcast %75 : vector<1x256xf32> to vector<4x256xf32>
    %77 = arith.mulf %73, %76 : vector<4x256xf32>
    %c8_54 = arith.constant 8 : index
    %c0_55 = arith.constant 0 : index
    %78 = vector.load %arg8[%c8_54, %c0_55] : memref<36x256xf32, #tpu.memory_space<vmem>>, vector<4x256xf32>
    tpu.vector_store %arg8[%c8_54, %c0_55], %77 {strides = array<i32>} : memref<36x256xf32, #tpu.memory_space<vmem>>, vector<4x256xf32>,
    %c1_i32_56 = arith.constant 1 : i32
    %79 = tpu.dynamic_rotate %60 by %c1_i32_56 dim 1 : vector<4x256xf32>, i32 -> vector<4x256xf32>
    %c3_57 = arith.constant 3 : index
    %c0_58 = arith.constant 0 : index
    %c0_59 = arith.constant 0 : index
    %80 = vector.load %arg6[%c3_57, %c0_58, %c0_59] : memref<9x1x256xf32, #tpu.memory_space<vmem>>, vector<1x1x256xf32>
    %81 = vector.shape_cast %80 : vector<1x1x256xf32> to vector<1x256xf32>
    %82 = vector.broadcast %81 : vector<1x256xf32> to vector<4x256xf32>
    %83 = arith.mulf %79, %82 : vector<4x256xf32>
    %c12_60 = arith.constant 12 : index
    %c0_61 = arith.constant 0 : index
    %84 = vector.load %arg8[%c12_60, %c0_61] : memref<36x256xf32, #tpu.memory_space<vmem>>, vector<4x256xf32>
    tpu.vector_store %arg8[%c12_60, %c0_61], %83 {strides = array<i32>} : memref<36x256xf32, #tpu.memory_space<vmem>>, vector<4x256xf32>,
    %c16_62 = arith.constant 16 : index
    %c0_63 = arith.constant 0 : index
    %85 = vector.load %arg8[%c16_62, %c0_63] : memref<36x256xf32, #tpu.memory_space<vmem>>, vector<4x256xf32>
    tpu.vector_store %arg8[%c16_62, %c0_63], %60 {strides = array<i32>} : memref<36x256xf32, #tpu.memory_space<vmem>>, vector<4x256xf32>,
    %c255_i32_64 = arith.constant 255 : i32
    %86 = tpu.dynamic_rotate %60 by %c255_i32_64 dim 1 : vector<4x256xf32>, i32 -> vector<4x256xf32>
    %c5_65 = arith.constant 5 : index
    %c0_66 = arith.constant 0 : index
    %c0_67 = arith.constant 0 : index
    %87 = vector.load %arg6[%c5_65, %c0_66, %c0_67] : memref<9x1x256xf32, #tpu.memory_space<vmem>>, vector<1x1x256xf32>
    %88 = vector.shape_cast %87 : vector<1x1x256xf32> to vector<1x256xf32>
    %89 = vector.broadcast %88 : vector<1x256xf32> to vector<4x256xf32>
    %90 = arith.mulf %86, %89 : vector<4x256xf32>
    %c20_68 = arith.constant 20 : index
    %c0_69 = arith.constant 0 : index
    %91 = vector.load %arg8[%c20_68, %c0_69] : memref<36x256xf32, #tpu.memory_space<vmem>>, vector<4x256xf32>
    tpu.vector_store %arg8[%c20_68, %c0_69], %90 {strides = array<i32>} : memref<36x256xf32, #tpu.memory_space<vmem>>, vector<4x256xf32>,
    %c241_i32_70 = arith.constant 241 : i32
    %92 = tpu.dynamic_rotate %60 by %c241_i32_70 dim 1 : vector<4x256xf32>, i32 -> vector<4x256xf32>
    %c6_71 = arith.constant 6 : index
    %c0_72 = arith.constant 0 : index
    %c0_73 = arith.constant 0 : index
    %93 = vector.load %arg6[%c6_71, %c0_72, %c0_73] : memref<9x1x256xf32, #tpu.memory_space<vmem>>, vector<1x1x256xf32>
    %94 = vector.shape_cast %93 : vector<1x1x256xf32> to vector<1x256xf32>
    %95 = vector.broadcast %94 : vector<1x256xf32> to vector<4x256xf32>
    %96 = arith.mulf %92, %95 : vector<4x256xf32>
    %c24_74 = arith.constant 24 : index
    %c0_75 = arith.constant 0 : index
    %97 = vector.load %arg8[%c24_74, %c0_75] : memref<36x256xf32, #tpu.memory_space<vmem>>, vector<4x256xf32>
    tpu.vector_store %arg8[%c24_74, %c0_75], %96 {strides = array<i32>} : memref<36x256xf32, #tpu.memory_space<vmem>>, vector<4x256xf32>,
    %c240_i32_76 = arith.constant 240 : i32
    %98 = tpu.dynamic_rotate %60 by %c240_i32_76 dim 1 : vector<4x256xf32>, i32 -> vector<4x256xf32>
    %c7_77 = arith.constant 7 : index
    %c0_78 = arith.constant 0 : index
    %c0_79 = arith.constant 0 : index
    %99 = vector.load %arg6[%c7_77, %c0_78, %c0_79] : memref<9x1x256xf32, #tpu.memory_space<vmem>>, vector<1x1x256xf32>
    %100 = vector.shape_cast %99 : vector<1x1x256xf32> to vector<1x256xf32>
    %101 = vector.broadcast %100 : vector<1x256xf32> to vector<4x256xf32>
    %102 = arith.mulf %98, %101 : vector<4x256xf32>
    %c28_80 = arith.constant 28 : index
    %c0_81 = arith.constant 0 : index
    %103 = vector.load %arg8[%c28_80, %c0_81] : memref<36x256xf32, #tpu.memory_space<vmem>>, vector<4x256xf32>
    tpu.vector_store %arg8[%c28_80, %c0_81], %102 {strides = array<i32>} : memref<36x256xf32, #tpu.memory_space<vmem>>, vector<4x256xf32>,
    %c239_i32_82 = arith.constant 239 : i32
    %104 = tpu.dynamic_rotate %60 by %c239_i32_82 dim 1 : vector<4x256xf32>, i32 -> vector<4x256xf32>
    %c8_83 = arith.constant 8 : index
    %c0_84 = arith.constant 0 : index
    %c0_85 = arith.constant 0 : index
    %105 = vector.load %arg6[%c8_83, %c0_84, %c0_85] : memref<9x1x256xf32, #tpu.memory_space<vmem>>, vector<1x1x256xf32>
    %106 = vector.shape_cast %105 : vector<1x1x256xf32> to vector<1x256xf32>
    %107 = vector.broadcast %106 : vector<1x256xf32> to vector<4x256xf32>
    %108 = arith.mulf %104, %107 : vector<4x256xf32>
    %c32_86 = arith.constant 32 : index
    %c0_87 = arith.constant 0 : index
    %109 = vector.load %arg8[%c32_86, %c0_87] : memref<36x256xf32, #tpu.memory_space<vmem>>, vector<4x256xf32>
    tpu.vector_store %arg8[%c32_86, %c0_87], %108 {strides = array<i32>} : memref<36x256xf32, #tpu.memory_space<vmem>>, vector<4x256xf32>,
    %c0_88 = arith.constant 0 : index
    %c0_89 = arith.constant 0 : index
    %110 = vector.load %arg4[%c0_88, %c0_89] : memref<4x36xf32, #tpu.memory_space<vmem>>, vector<4x36xf32>
    %c0_90 = arith.constant 0 : index
    %c0_91 = arith.constant 0 : index
    %111 = vector.load %arg8[%c0_90, %c0_91] : memref<36x256xf32, #tpu.memory_space<vmem>>, vector<36x256xf32>
    %cst_92 = arith.constant dense<0.000000e+00> : vector<4x256xf32>
    %112 = tpu.matmul %110, %111, %cst_92 {dimension_numbers = #tpu.dot_dimension_numbers<[1], [0], [0], [1], [0, 0, 1, 1], [], []>} : vector<4x36xf32>, vector<36x256xf32>, vector<4x256xf32> -> vector<4x256xf32>
    %c0_93 = arith.constant 0 : index
    %c0_94 = arith.constant 0 : index
    %113 = vector.load %arg5[%c0_93, %c0_94] : memref<4x1xf32, #tpu.memory_space<vmem>>, vector<4x1xf32>
    %114 = vector.broadcast %113 : vector<4x1xf32> to vector<4x256xf32>
    %115 = arith.addf %112, %114 : vector<4x256xf32>
    %116 = arith.addf %115, %1 : vector<4x256xf32>
    %c0_95 = arith.constant 0 : index
    %c0_96 = arith.constant 0 : index
    %c0_97 = arith.constant 0 : index
    %117 = vector.load %arg7[%c0_95, %c0_96, %c0_97] : memref<1x4x256xf32, #tpu.memory_space<vmem>>, vector<1x4x256xf32>
    %118 = vector.shape_cast %117 : vector<1x4x256xf32> to vector<4x256xf32>
    %119 = vector.shape_cast %116 : vector<4x256xf32> to vector<1x4x256xf32>
    tpu.vector_store %arg7[%c0_95, %c0_96, %c0_97], %119 {strides = array<i32>} : memref<1x4x256xf32, #tpu.memory_space<vmem>>, vector<1x4x256xf32>,
    return
  }
  func.func @transform_0(%arg0: i32) -> (i32, i32, i32) {
    %c0_i32 = arith.constant 0 : i32
    %c0_i32_0 = arith.constant 0 : i32
    %c0_i32_1 = arith.constant 0 : i32
    return %arg0, %c0_i32, %c0_i32_0 : i32, i32, i32
  }
  func.func @transform_1(%arg0: i32) -> (i32, i32) {
    %c0_i32 = arith.constant 0 : i32
    %c0_i32_0 = arith.constant 0 : i32
    %c0_i32_1 = arith.constant 0 : i32
    return %c0_i32, %c0_i32_0 : i32, i32
  }
  func.func @transform_2(%arg0: i32) -> (i32, i32) {
    %c0_i32 = arith.constant 0 : i32
    %c0_i32_0 = arith.constant 0 : i32
    %c0_i32_1 = arith.constant 0 : i32
    return %c0_i32, %c0_i32_0 : i32, i32
  }
  func.func @transform_3(%arg0: i32) -> (i32, i32) {
    %c0_i32 = arith.constant 0 : i32
    %c0_i32_0 = arith.constant 0 : i32
    %c0_i32_1 = arith.constant 0 : i32
    return %c0_i32, %c0_i32_0 : i32, i32
  }
  func.func @transform_4(%arg0: i32) -> (i32, i32) {
    %c0_i32 = arith.constant 0 : i32
    %c0_i32_0 = arith.constant 0 : i32
    %c0_i32_1 = arith.constant 0 : i32
    return %c0_i32, %c0_i32_0 : i32, i32
  }
  func.func @transform_5(%arg0: i32) -> (i32, i32, i32) {
    %c0_i32 = arith.constant 0 : i32
    %c0_i32_0 = arith.constant 0 : i32
    %c0_i32_1 = arith.constant 0 : i32
    %c0_i32_2 = arith.constant 0 : i32
    return %c0_i32, %c0_i32_0, %c0_i32_1 : i32, i32, i32
  }
  func.func @transform_6(%arg0: i32) -> (i32, i32, i32) {
    %c0_i32 = arith.constant 0 : i32
    %c0_i32_0 = arith.constant 0 : i32
    %c0_i32_1 = arith.constant 0 : i32
    return %arg0, %c0_i32, %c0_i32_0 : i32, i32, i32
  }
}

</mosaic_0001>

<bundles_post_ra>
// kernel: tpu_custom_call.1
= control target key start
LH: loop header
LB: loop body
LE: loop exit
PB: predicated region body
PF: predicated region fallthrough
CT: control target
= control target key end

     0   :  { %s1726_s0 = inlined_call_operand.hbm [shape: f32[2,4,256], index: 0, kind: input, shape index: {}]   ;;  %s1727_s1 = inlined_call_operand.hbm [shape: f32[4,36], index: 1, kind: input, shape index: {}]   ;;  %s1728_s2 = inlined_call_operand.vmem [shape: f32[4,1], index: 2, kind: input, shape index: {}]   ;;  %s1729_s3 = inlined_call_operand.hbm [shape: f32[4,36], index: 3, kind: input, shape index: {}]   ;;  %s1730_s4 = inlined_call_operand.vmem [shape: f32[4,1], index: 4, kind: input, shape index: {}]   ;;  %s1731_s5 = inlined_call_operand.vmem [shape: f32[9,1,256], index: 5, kind: input, shape index: {}]   ;;  %s1732_s6 = inlined_call_operand.hbm [shape: f32[2,4,256], index: 6, kind: output, shape index: {}]  }
   0x1   :  { %1737 = sst [smem:[#allocation13_spill]] %s1727_s1 }
   0x2   :  { %11 = vsyncpa [#allocation4], 0 }
   0x3   :  { %13 = vsyncpa [#allocation4 + $0x1], 0 }
   0x4   :  { %14 = vsyncpa [#allocation7], 0 }
   0x5   :  { %15 = vsyncpa [#allocation5], 0 }
   0x6   :  { %17 = vsyncpa [#allocation5 + $0x1], 0  ;;  %s1349_s21 = smov 0   ;;  %s1351_s22 = smov 0  }
   0x7   :  { %s1353_s23 = smov 0   ;;  %s1355_s24 = smov 0  }
   0x8 LB: > { %s1370_s25 = sadd.s32 4294967295, %s1298_s24   ;;  %s1031_s26 = sadd.s32 4294967294, %s1298_s24   ;;  %s1298_s24 = sphi %s1355_s24, %s1756_s24   ;;  %s1294_s23 = sphi %s1353_s23, %s1755_s23   ;;  %s1290_s22 = sphi %s1351_s22, %s1754_s22   ;;  %s1286_s21 = sphi %s1349_s21, %s1753_s21  }
   0x9   : > { %p43_p0 = scmp.ne.s32.totalorder %s1290_s22, %s1286_s21  ;;  %p1733_p1 = scmp.eq.s32.totalorder %s1370_s25, 0 }
   0xa   : > { %p178_p3 = scmp.eq.s32.totalorder %s1031_s26, 1  ;;  %p1032_p5 = scmp.ge.s32.totalorder %s1298_s24, 1 }
   0xb   : > { %p1379_p4 = por %p1733_p1, %p43_p0  ;;  %p185_p7 = scmp.lt.s32.totalorder %s1298_s24, 3 }
   0xc   : > { %p1384_p6 = por %p178_p3, %p43_p0  ;;  %s1300_s30 = smov [#allocation6]  }
   0xd   : > { %s1738_s27 = scalar_select %p1379_p4, 1, 0 }
   0xe   : > { %s1739_s28 = scalar_select %p1384_p6, 1, 0 }
   0xf   : > { %p1389_p8 = pnand %p1032_p5, %p185_p7  ;;  %s198_s7 = sshll.u32 %s1300_s30, 4  ;;  %s199_s7 = int_to_ptr.vmem [resolvable:$true] %s198_s7 }
  0x10   : > { %s1301_s8 = smov [#allocation8]   ;;  %s1403_s11 = sadd.s32 1, %s1298_s24  }
  0x11   : > { %s1740_s29 = scalar_select %p1389_p8, 1, 0 }
  0x12   : > { %p1083_p10 = pneg %p1389_p8  ;;  %s212_s9 = sshll.u32 %s1301_s8, 4  ;;  %s213_s9 = int_to_ptr.vmem [resolvable:$true] %s212_s9 }
  0x13   : > { %s27_s12 = ssub.s32 %s1298_s24, %s1403_s11  ;;  %s1161_s13 = scalar_lea.vmem %s199_s7, 64 }
  0x14   : > { %p1398_p11 = pnand %p1083_p10, %p1733_p1  ;;  %p1162_p13 = scmp.ne.s32.totalorder %s199_s7, %s1161_s13 }
  0x15   : > { %p1169_p5 = scmp.lt.s32.totalorder %s199_s7, %s199_s7  ;;  %p1170_p7 = scmp.lt.s32.totalorder %s1161_s13, %s1161_s13 }
  0x16   : > { %p1152_p12 = pneg %p1398_p11 }
  0x17   : > { %p1171_p10 = por %p1170_p7, %p1169_p5 }
  0x18   : > { %p1164_p0 = pnand %p1162_p13, %p1152_p12 }
  0x1a   : > { %p1165_p3 = pneg %p1164_p0 }
  0x1c   : > { %p1172_p9 = pnand %p1171_p10, %p1165_p3 }
  0x1e   : > { %1175 = shalt.err (!%p1172_p9)
}
  0x1f   : > { %s1742_s1 = sld [smem:[#allocation13_spill]]  ;;  %s1187_s16 = scalar_lea.vmem %s213_s9, 64 }
  0x20   : > { %p1188_p1 = scmp.ne.s32.totalorder %s213_s9, %s1187_s16  ;;  %p1195_p13 = scmp.lt.s32.totalorder %s213_s9, %s213_s9 }
  0x21   : > { %p1196_p0 = scmp.lt.s32.totalorder %s1187_s16, %s1187_s16 }
  0x22   : > { %p1190_p2 = pnand %p1188_p1, %p1152_p12 }
  0x23   : > { %p1197_p4 = por %p1196_p0, %p1195_p13 }
  0x24   : > { %p1191_p6 = pneg %p1190_p2 }
  0x25   : > { %1086 = dma.hbm_to_vmem [thread:$0]  (!%p1398_p11), %s1742_s1, 64, %s199_s7, [#allocation7]  }
  0x26   : > { %p1198_p8 = pnand %p1197_p4, %p1191_p6 }
  0x28   : > { %1201 = shalt.err (!%p1198_p8)
}
  0x29   : > { %1089 = dma.hbm_to_vmem [thread:$0]  (!%p1398_p11), %s1729_s3, 64, %s213_s9, [#allocation7]  }
  0x2a   : > { %p28_p1 = scmp.eq.s32.totalorder %s27_s12, 0  ;;  %s30_s19 = sadd.s32 1, %s1294_s23 }
  0x2b   : > { %p37_p2 = scmp.ne.s32.totalorder %s1294_s23, %s1290_s22  ;;  %p38_p4 = scmp.eq.s32.totalorder %s1298_s24, 0 }
  0x2c   : > { %s1430_s20 = scalar_select %p28_p1, %s1294_s23, %s30_s19  }
  0x2d   : > { %p39_p6 = por %p38_p4, %p37_p2  ;;  %p1743_p8 = scmp.eq.s32.totalorder %s1370_s25, 1 }
  0x2e   : > { %p1100_p12 = scmp.lt.s32.totalorder %s1298_s24, 2  ;;  %s229_s30 = sand.u32 1, %s1294_s23  }
  0x2f   : > { %p1434_p9 = por %p1743_p8, %p37_p2  ;;  %s1036_s7 = sshll.u32 %s229_s30, 3 }
  0x30   : > { %s1069_s8 = sshll.u32 %s1298_s24, 7  ;;  %s233_s12 = scalar_lea.vmem [#allocation3], %s1036_s7 }
  0x31   : > { %s1744_s26 = scalar_select %p1434_p9, 1, 0 }
  0x32   : > { %s1444_s9 = scalar_lea.hbm %s1726_s0, %s1069_s8  ;;  %s241_s14 = sshll.u32 %s233_s12, 4  ;;  %s242_s14 = int_to_ptr.vmem [resolvable:$true] %s241_s14 }
  0x33   : > { %p1446_p11 = pnand %p1100_p12, %p39_p6  ;;  %s230_s16 = scalar_lea.sflag [#allocation4], %s229_s30 }
  0x34   : > { %s1202_s17 = scalar_lea.hbm %s1444_s9, 128  ;;  %s1207_s8 = scalar_lea.hbm %s1726_s0, 256 }
  0x35   : > { %p1203_p3 = scmp.ne.s32.totalorder %s1444_s9, %s1202_s17  ;;  %p1204_p5 = pneg %p1446_p11 }
  0x36   : > { %p1208_p13 = scmp.lt.s32.totalorder %s1444_s9, %s1726_s0  ;;  %p1209_p0 = scmp.lt.s32.totalorder %s1207_s8, %s1202_s17 }
  0x37   : > { %p1205_p7 = pnand %p1204_p5, %p1203_p3 }
  0x38   : > { %p1210_p1 = por %p1209_p0, %p1208_p13 }
  0x39   : > { %p1206_p10 = pneg %p1205_p7 }
  0x3b   : > { %p1211_p2 = pnand %p1210_p1, %p1206_p10 }
  0x3d   : > { %1214 = shalt.err (!%p1211_p2)
}
  0x3e   : > { %s1215_s13 = scalar_lea.vmem %s242_s14, 128  ;;  %s1302_s30 = smov [#allocation3]  }
  0x3f   : > { %p1216_p4 = scmp.ne.s32.totalorder %s242_s14, %s1215_s13  ;;  %s1220_s12 = sshll.u32 %s1302_s30, 4  ;;  %s1221_s12 = int_to_ptr.vmem [resolvable:$false] %s1220_s12 }
  0x40   : > { %s1222_s1 = scalar_lea.vmem %s1221_s12, 256  ;;  %p1223_p12 = scmp.lt.s32.totalorder %s242_s14, %s1221_s12 }
  0x41   : > { %p1218_p6 = pnand %p1216_p4, %p1204_p5  ;;  %p1224_p3 = scmp.lt.s32.totalorder %s1222_s1, %s1215_s13 }
  0x43   : > { %p1219_p8 = pneg %p1218_p6  ;;  %p1225_p7 = por %p1224_p3, %p1223_p12 }
  0x45   : > { %p1226_p9 = pnand %p1225_p7, %p1219_p8 }
  0x47   : > { %1229 = shalt.err (!%p1226_p9)
}
  0x48   : > { %1093 = dma.hbm_to_vmem [thread:$0]  (!%p1446_p11), %s1444_s9, 128, %s242_s14, %s230_s16  }
  0x49   : > { %p1746_p10 = scmp.ne.s32.totalorder %s1740_s29, 0 }
  0x4a   : > { %s1467_s17 = sand.u32 (!%p1746_p10), 1, %s1290_s22   ;;  %p1747_p5 = scmp.ne.s32.totalorder (!%p1746_p10), %s1738_s27, 0 }
  0x4b   : > { %250 = sbr.rel (%p1746_p10) target bundleno = 814 (0x32e), region = 44  ;;  %s1040_s18 = sshll.u32 (!%p1746_p10), %s1467_s17, 3 }
  0x4c   : > { %s253_s19 = scalar_lea.sflag (!%p1746_p10), [#allocation4], %s1467_s17  ;;  %s256_s1 = scalar_lea.vmem (!%p1746_p10), [#allocation3], %s1040_s18 }
  0x50   : > { %1273 = dma.done.wait (%p1747_p5), %s253_s19, 128  }
  0x51   : > { %1275 = vsyncadd (%p1747_p5), %s253_s19, 4294967168  ;;  %p1748_p9 = scmp.eq.s32.totalorder %s1370_s25, 0 }
  0x53   : > { %1277 = dma.done.wait (%p1748_p9), [#allocation7], 128   ;;  %p1749_p11 = pmov %p1748_p9 }
  0x54   : > { %v1481_v0 = vld [vmem:[%s256_s1] sm:$0xff]  ;;  %s1303_s29 = smov 111   ;;  %s1304_s9 = smov 112   ;;  %v1310_v3 = vmov 0.0   ;;  %v1312_v4 = vmov 0   ;;  %v302_v6 = vlaneseq  ;;  %vm538_vm4 = vcmask 1043456  }
  0x55   : > { %1279 = vsyncadd (%p1749_p11), [#allocation7], 4294967168  ;;  %v294_v1 = vmax.f32 %v1481_v0, 0.0  ;;  %s1305_s27 = smov 127   ;;  %s1306_s14 = smov 113   ;;  %609 = vmatprep.mubr.f32.mxu0 %v1310_v3  ;;  %910 = vmatprep.mubr.f32.mxu1 %v1310_v3  ;;  %vm534_vm9 = vcmask 293888  }
  0x56   : > { %s1307_s15 = smov 1   ;;  %s1308_s16 = smov 16   ;;  %1148 = vset.pattern.permute.xlu0 %v1312_v4  ;;  %v528_v5 = vld [vmem:[%s1728_s2] sm:$0xf]  ;;  %v310_v7 = vshrl.u32 %v302_v6, 7  ;;  %v1503_v8 = vand.u32 127, %v302_v6 }
  0x57   : > { %493 = vrot.lane.b32.xlu1 %v294_v1, %s1303_s29  ;;  %407 = vst [vmem:[#allocation2 + $0x48] sm:$0xf] %v294_v1  ;;  %463 = vrot.lane.b32.xlu0 %v294_v1, %s1304_s9  ;;  %v296_v2 = vcombine.high %v294_v1, %v294_v1  ;;  %s1309_s8 = smov 15   ;;  %s1311_s10 = smov 17   ;;  %v1050_v11 = vld [vmem:[%s1731_s5 + $0x10] sm:$0x3] }
  0x58   : > { %v1505_v9 = vsub.s32 0, %v310_v7  ;;  %v1507_v10 = vsub.s32 1, %v310_v7  ;;  %vm497_vm0 = vcmp.lt.s32.totalorder %v1503_v8, 111  ;;  %v1047_v16 = vld [vmem:[%s1731_s5 + $0xa] sm:$0x3]  ;;  %vm413_vm1 = vcmp.lt.s32.totalorder %v1503_v8, 127 }
  0x59   : > { %408 = vst [vmem:[#allocation2 + $0x28] sm:$0xf] %v296_v2  ;;  %v1048_v21 = vld [vmem:[%s1731_s5 + $0xc] sm:$0x3]  ;;  %v1049_v26 = vld [vmem:[%s1731_s5 + $0xe] sm:$0x3] }
  0x5a   : > { %v506_v14 = vrot.slane %v1050_v11, %v1505_v9  ;;  %v510_v15 = vrot.slane %v1050_v11, %v1507_v10  ;;  %v422_v24 = vrot.slane %v1047_v16, %v1505_v9  ;;  %v426_v25 = vrot.slane %v1047_v16, %v1507_v10  ;;  %v1046_v33 = vld [vmem:[%s1731_s5 + $0x6] sm:$0x3]  ;;  %v1044_v54 = vld [vmem:[%s1731_s5 + $0x2] sm:$0x3]  ;;  %v307_v16 = vld [vmem:[%s1731_s5] sm:$0x3] }
  0x5b   : > { %409 = vrot.lane.b32.xlu0 %v294_v1, %s1305_s27  ;;  %495 = vrot.lane.b32.xlu1 %v296_v2, %s1303_s29  ;;  %vm443_vm2 = vcmp.lt.s32.totalorder %v1503_v8, 113  ;;  %v452_v29 = vrot.slane %v1048_v21, %v1505_v9  ;;  %v456_v32 = vrot.slane %v1048_v21, %v1507_v10  ;;  %vm467_vm3 = vcmp.lt.s32.totalorder %v1503_v8, 112  ;;  %s928_s30 = scalar_lea.sflag [#allocation5], %s1467_s17  ;;  %p1750_p0 = scmp.ne.s32.totalorder %s1744_s26, 0 }
  0x5c   : > { %v476_v36 = vrot.slane %v1049_v26, %v1505_v9  ;;  %v480_v37 = vrot.slane %v1049_v26, %v1507_v10  ;;  %vm381_vm5 = vcmp.lt.s32.totalorder %v1503_v8, 1  ;;  %v390_v42 = vrot.slane %v1046_v33, %v1505_v9 }
  0x5d   : > { %v394_v43 = vrot.slane %v1046_v33, %v1507_v10  ;;  %vm327_vm6 = vcmp.lt.s32.totalorder %v1503_v8, 16  ;;  %v336_v63 = vrot.slane %v1044_v54, %v1505_v9  ;;  %vm357_vm7 = vcmp.lt.s32.totalorder %v1503_v8, 15 }
  0x5e   : > { %vm304_vm8 = vcmp.lt.s32.totalorder %v1503_v8, 17 }
  0x5f   : > { %439 = vrot.lane.b32.xlu0 %v294_v1, %s1306_s14  ;;  %411 = vrot.lane.b32.xlu1 %v296_v2, %s1305_s27 }
  0x63   : > { %441 = vrot.lane.b32.xlu1 %v296_v2, %s1306_s14  ;;  %465 = vrot.lane.b32.xlu0 %v296_v2, %s1304_s9 }
  0x67   : > { %379 = vrot.lane.b32.xlu1 %v296_v2, %s1307_s15  ;;  %377 = vrot.lane.b32.xlu0 %v294_v1, %s1307_s15 }
  0x6b   : > { %325 = vrot.lane.b32.xlu1 %v296_v2, %s1308_s16  ;;  %323 = vrot.lane.b32.xlu0 %v294_v1, %s1308_s16 }
  0x6f   : > { %355 = vrot.lane.b32.xlu1 %v296_v2, %s1309_s8  ;;  %353 = vrot.lane.b32.xlu0 %v294_v1, %s1309_s8 }
  0x73   : > { %300 = vrot.lane.b32.xlu1 %v296_v2, %s1311_s10  ;;  %298 = vrot.lane.b32.xlu0 %v294_v1, %s1311_s10  ;;  %v340_v1 = vrot.slane %v1044_v54, %v1507_v10  ;;  %v1045_v2 = vld [vmem:[%s1731_s5 + $0x4] sm:$0x3] }
  0x77   : > { %531 = vperm.xlu0 %1148, %v528_v5  }
  0xc9   : > { %v494_v12 = vpop.permute.xlu1 %493  ;;  %v464_v13 = vpop.permute.xlu0 %463 }
  0xcd   : > { %v410_v17 = vpop.permute.xlu0 %409  ;;  %v496_v18 = vpop.permute.xlu1 %495 }
  0xce   : > { %v498_v19 = vsel %vm497_vm0, %v494_v12, %v496_v18  ;;  %v499_v20 = vsel %vm497_vm0, %v496_v18, %v494_v12 }
  0xcf   : > { %v513_v22 = vmul.f32 %v506_v14, %v498_v19  ;;  %v514_v23 = vmul.f32 %v510_v15, %v499_v20  ;;  %v366_v14 = vrot.slane %v1045_v2, %v1505_v9  ;;  %v370_v15 = vrot.slane %v1045_v2, %v1507_v10 }
  0xd1   : > { %515 = vst [vmem:[#allocation2 + $0x40] sm:$0xf] %v513_v22  ;;  %516 = vst [vmem:[#allocation2 + $0x38] sm:$0xf] %v514_v23  ;;  %v440_v27 = vpop.permute.xlu0 %439  ;;  %v412_v28 = vpop.permute.xlu1 %411 }
  0xd2   : > { %v414_v30 = vsel %vm413_vm1, %v410_v17, %v412_v28  ;;  %v415_v31 = vsel %vm413_vm1, %v412_v28, %v410_v17  ;;  %v316_v28 = vrot.slane %v307_v16, %v1507_v10 }
  0xd3   : > { %v429_v34 = vmul.f32 %v422_v24, %v414_v30  ;;  %v430_v35 = vmul.f32 %v426_v25, %v415_v31 }
  0xd5   : > { %v433_v38 = vrot.slane %v429_v34, 4  ;;  %v434_v39 = vrot.slane %v430_v35, 4  ;;  %v442_v40 = vpop.permute.xlu1 %441  ;;  %v466_v41 = vpop.permute.xlu0 %465 }
  0xd6   : > { %v444_v44 = vsel %vm443_vm2, %v440_v27, %v442_v40  ;;  %v445_v45 = vsel %vm443_vm2, %v442_v40, %v440_v27  ;;  %v468_v46 = vsel %vm467_vm3, %v464_v13, %v466_v41  ;;  %v469_v47 = vsel %vm467_vm3, %v466_v41, %v464_v13  ;;  %v517_v41 = vld [vmem:[#allocation6] sm:$0xf] }
  0xd7   : > { %437 = vst [vmem:[#allocation2 + $0x48] sm:$0xf0] %v433_v38  ;;  %438 = vst [vmem:[#allocation2 + $0x28] sm:$0xf0] %v434_v39  ;;  %v459_v48 = vmul.f32 %v452_v29, %v444_v44  ;;  %v460_v49 = vmul.f32 %v456_v32, %v445_v45  ;;  %v483_v50 = vmul.f32 %v476_v36, %v468_v46 }
  0xd8   : > { %v484_v51 = vmul.f32 %v480_v37, %v469_v47  ;;  %v527_v52 = vld [vmem:[#allocation2 + $0x38] sm:$0xf]  ;;  %v526_v53 = vld [vmem:[#allocation2 + $0x40] sm:$0xf]  ;;  %v312_v27 = vrot.slane %v307_v16, %v1505_v9 }
  0xd9   : > { %461 = vst [vmem:[#allocation2 + $0x8] sm:$0xf] %v459_v48  ;;  %462 = vst [vmem:[#allocation2 + $0x20] sm:$0xf] %v460_v49  ;;  %v487_v55 = vrot.slane %v483_v50, 4  ;;  %1051 = vmatprep.subr.msk.mxu0 %vm538_vm4, %v527_v52  ;;  %v380_v57 = vpop.permute.xlu1 %379  ;;  %v378_v58 = vpop.permute.xlu0 %377 }
  0xda   : > { %v488_v56 = vrot.slane %v484_v51, 4  ;;  %v382_v59 = vsel %vm381_vm5, %v378_v58, %v380_v57  ;;  %v383_v60 = vsel %vm381_vm5, %v380_v57, %v378_v58  ;;  %1052 = vmatpush1.msk.msra.mxu0 %vm538_vm4, %v526_v53  ;;  %v831_v49 = vld [vmem:[%s1730_s4] sm:$0xf]  ;;  %v1059_v50 = vld [vmem:[%s1731_s5 + $0xe] sm:$0x3] }
  0xdb   : > { %491 = vst [vmem:[#allocation2 + $0x8] sm:$0xf0] %v487_v55  ;;  %v397_v61 = vmul.f32 %v390_v42, %v383_v60  ;;  %v398_v62 = vmul.f32 %v394_v43, %v382_v59  ;;  %v781_v53 = vrot.slane %v1059_v50, %v1505_v9  ;;  %v785_v54 = vrot.slane %v1059_v50, %v1507_v10  ;;  %v1060_v55 = vld [vmem:[%s1731_s5 + $0x10] sm:$0x3] }
  0xdc   : > { %492 = vst [vmem:[#allocation2 + $0x20] sm:$0xf0] %v488_v56 }
  0xdd   : > { %v401_v3 = vrot.slane %v397_v61, 4  ;;  %v402_v4 = vrot.slane %v398_v62, 4  ;;  %v326_v5 = vpop.permute.xlu1 %325  ;;  %v324_v6 = vpop.permute.xlu0 %323  ;;  %v809_v62 = vrot.slane %v1060_v55, %v1505_v9 }
  0xde   : > { %v328_v7 = vsel %vm327_vm6, %v324_v6, %v326_v5  ;;  %v329_v11 = vsel %vm327_vm6, %v326_v5, %v324_v6  ;;  %v523_v29 = vld [vmem:[#allocation2 + $0x28] sm:$0xff] }
  0xdf   : > { %405 = vst [vmem:[#allocation2 + $0x18] sm:$0xf0] %v401_v3  ;;  %406 = vst [vmem:[#allocation2 + $0x10] sm:$0xf0] %v402_v4  ;;  %v343_v12 = vmul.f32 %v336_v63, %v329_v11  ;;  %v344_v13 = vmul.f32 %v340_v1, %v328_v7  ;;  %v522_v32 = vld [vmem:[#allocation2 + $0x48] sm:$0xff]  ;;  %v813_v63 = vrot.slane %v1060_v55, %v1507_v10 }
  0xe0   : > { %v1057_v1 = vld [vmem:[%s1731_s5 + $0xa] sm:$0x3] }
  0xe1   : > { %v347_v17 = vrot.slane %v343_v12, 4  ;;  %v348_v18 = vrot.slane %v344_v13, 4  ;;  %v356_v19 = vpop.permute.xlu1 %355  ;;  %v354_v20 = vpop.permute.xlu0 %353  ;;  %v731_v13 = vrot.slane %v1057_v1, %v1505_v9 }
  0xe2   : > { %v358_v21 = vsel %vm357_vm7, %v354_v20, %v356_v19  ;;  %v359_v22 = vsel %vm357_vm7, %v356_v19, %v354_v20  ;;  %v524_v24 = vld [vmem:[#allocation2 + $0x8] sm:$0xff] }
  0xe3   : > { %v525_v23 = vld [vmem:[#allocation2 + $0x20] sm:$0xff]  ;;  %351 = vst [vmem:[#allocation2 + $0x30] sm:$0xf0] %v347_v17  ;;  %352 = vst [vmem:[#allocation2] sm:$0xf0] %v348_v18  ;;  %v373_v25 = vmul.f32 %v366_v14, %v359_v22  ;;  %v374_v26 = vmul.f32 %v370_v15, %v358_v21  ;;  %v735_v14 = vrot.slane %v1057_v1, %v1507_v10 }
  0xe4   : > { %569 = vmatprep.subr.mxu0 %v525_v23  ;;  %v1058_v15 = vld [vmem:[%s1731_s5 + $0xc] sm:$0x3] }
  0xe5   : > { %570 = vmatpush1.msra.mxu0 %v524_v24  ;;  %375 = vst [vmem:[#allocation2 + $0x18] sm:$0xf] %v373_v25  ;;  %376 = vst [vmem:[#allocation2 + $0x10] sm:$0xf] %v374_v26  ;;  %v301_v30 = vpop.permute.xlu1 %300  ;;  %v299_v31 = vpop.permute.xlu0 %298  ;;  %v759_v22 = vrot.slane %v1058_v15, %v1505_v9  ;;  %v763_v23 = vrot.slane %v1058_v15, %v1507_v10  ;;  %v1056_v24 = vld [vmem:[%s1731_s5 + $0x6] sm:$0x3] }
  0xe6   : > { %571 = vmatprep.subr.mxu0 %v523_v29  ;;  %v305_v33 = vsel %vm304_vm8, %v299_v31, %v301_v30  ;;  %v306_v34 = vsel %vm304_vm8, %v301_v30, %v299_v31 }
  0xe7   : > { %572 = vmatpush1.msra.mxu0 %v522_v32  ;;  %v319_v35 = vmul.f32 %v312_v27, %v306_v34  ;;  %v320_v36 = vmul.f32 %v316_v28, %v305_v33  ;;  %v701_v32 = vrot.slane %v1056_v24, %v1505_v9  ;;  %v705_v33 = vrot.slane %v1056_v24, %v1507_v10 }
  0xe9   : > { %321 = vst [vmem:[#allocation2 + $0x30] sm:$0xf] %v319_v35  ;;  %322 = vst [vmem:[#allocation2] sm:$0xf] %v320_v36  ;;  %v1054_v36 = vld [vmem:[%s1731_s5 + $0x2] sm:$0x3] }
  0xec   : > { %v521_v37 = vld [vmem:[#allocation2 + $0x10] sm:$0xff]  ;;  %v520_v38 = vld [vmem:[#allocation2 + $0x18] sm:$0xff] }
  0xed   : > { %573 = vmatprep.subr.mxu0 %v521_v37 }
  0xee   : > { %574 = vmatpush1.msra.mxu0 %v520_v38 }
  0xf0   : > { %v519_v39 = vld [vmem:[#allocation2] sm:$0xff]  ;;  %v518_v40 = vld [vmem:[#allocation2 + $0x30] sm:$0xff] }
  0xf1   : > { %575 = vmatprep.subr.mxu0 %v519_v39 }
  0xf2   : > { %576 = vmatpush1.msra.mxu0 %v518_v40  ;;  %v532_v42 = vpop.permute.xlu0 %531 }
  0xf3   : > { %1053 = vmatmul.mubr.msk.f32.vlgmr.msra.gmra.mxu0 %vm534_vm9, %v517_v41 }
 0x1b3   : > { %v611_v43 = vpop.f32.mrf.mxu0 }
 0x1b4   : > { %v612_v44 = vadd.f32 %v611_v43, %v532_v42  ;;  %v651_v43 = vrot.slane %v1054_v36, %v1505_v9 }
 0x1b5   : > { %v613_v45 = vpop.f32.mrf.mxu0 }
 0x1b6   : > { %v616_v46 = vmax.f32 %v612_v44, 0.0  ;;  %v614_v47 = vadd.f32 %v613_v45, %v532_v42  ;;  %v655_v44 = vrot.slane %v1054_v36, %v1507_v10  ;;  %v1055_v45 = vld [vmem:[%s1731_s5 + $0x4] sm:$0x3] }
 0x1b7   : > { %v683_v55 = vrot.slane %v1055_v45, %v1507_v10 }
 0x1b8   : > { %718 = vst [vmem:[#allocation2 + $0x48] sm:$0xf] %v616_v46  ;;  %v617_v48 = vmax.f32 %v614_v47, 0.0  ;;  %798 = vrot.lane.b32.xlu0 %v616_v46, %s1303_s29  ;;  %770 = vrot.lane.b32.xlu1 %v616_v46, %s1304_s9 }
 0x1ba   : > { %719 = vst [vmem:[#allocation2 + $0x28] sm:$0xf] %v617_v48 }
 0x1bc   : > { %720 = vrot.lane.b32.xlu0 %v616_v46, %s1305_s27  ;;  %772 = vrot.lane.b32.xlu1 %v617_v48, %s1304_s9 }
 0x1c0   : > { %748 = vrot.lane.b32.xlu0 %v616_v46, %s1306_s14  ;;  %800 = vrot.lane.b32.xlu1 %v617_v48, %s1303_s29 }
 0x1c4   : > { %690 = vrot.lane.b32.xlu0 %v616_v46, %s1307_s15  ;;  %722 = vrot.lane.b32.xlu1 %v617_v48, %s1305_s27 }
 0x1c8   : > { %640 = vrot.lane.b32.xlu0 %v616_v46, %s1308_s16  ;;  %750 = vrot.lane.b32.xlu1 %v617_v48, %s1306_s14  ;;  %s1070_s14 = sshll.u32 %s1370_s25, 7  ;;  %s1313_s25 = smov [#allocation9]  }
 0x1c9   : > { %s940_s13 = scalar_lea.hbm %s1732_s6, %s1070_s14  ;;  %s1234_s19 = sshll.u32 %s1313_s25, 4  ;;  %s1235_s19 = int_to_ptr.vmem [resolvable:$false] %s1234_s19 }
 0x1cc   : > { %668 = vrot.lane.b32.xlu0 %v616_v46, %s1309_s8  ;;  %692 = vrot.lane.b32.xlu1 %v617_v48, %s1307_s15  ;;  %s292_s15 = scalar_lea.vmem [#allocation9], %s1040_s18  ;;  %s1236_s18 = scalar_lea.vmem %s1235_s19, 256 }
 0x1d0   : > { %618 = vrot.lane.b32.xlu0 %v616_v46, %s1311_s10  ;;  %642 = vrot.lane.b32.xlu1 %v617_v48, %s1308_s16  ;;  %s942_s16 = sshll.u32 %s292_s15, 4  ;;  %s943_s16 = int_to_ptr.vmem [resolvable:$true] %s942_s16 }
 0x1d1   : > { %s1230_s12 = scalar_lea.vmem %s943_s16, 128  ;;  %p1237_p4 = scmp.lt.s32.totalorder %s943_s16, %s1235_s19 }
 0x1d2   : > { %p1231_p13 = scmp.ne.s32.totalorder %s943_s16, %s1230_s12  ;;  %p1238_p6 = scmp.lt.s32.totalorder %s1236_s18, %s1230_s12 }
 0x1d4   : > { %834 = vperm.xlu0 %1148, %v831_v49   ;;  %670 = vrot.lane.b32.xlu1 %v617_v48, %s1309_s8  ;;  %p1232_p1 = pnand %p1231_p13, %p1750_p0  ;;  %p1239_p8 = por %p1238_p6, %p1237_p4 }
 0x1d6   : > { %p1233_p2 = pneg %p1232_p1 }
 0x1d8   : > { %620 = vrot.lane.b32.xlu1 %v617_v48, %s1311_s10  ;;  %p1240_p12 = pnand %p1239_p8, %p1233_p2 }
 0x22a   : > { %v799_v51 = vpop.permute.xlu0 %798  ;;  %v771_v52 = vpop.permute.xlu1 %770 }
 0x22e   : > { %v721_v56 = vpop.permute.xlu0 %720  ;;  %v773_v57 = vpop.permute.xlu1 %772 }
 0x22f   : > { %v774_v58 = vsel %vm467_vm3, %v771_v52, %v773_v57  ;;  %v775_v59 = vsel %vm467_vm3, %v773_v57, %v771_v52 }
 0x230   : > { %v788_v60 = vmul.f32 %v781_v53, %v774_v58  ;;  %v789_v61 = vmul.f32 %v785_v54, %v775_v59  ;;  %v679_v54 = vrot.slane %v1055_v45, %v1505_v9  ;;  %v624_v58 = vld [vmem:[%s1731_s5] sm:$0x3] }
 0x232   : > { %v792_v2 = vrot.slane %v788_v60, 4  ;;  %v793_v3 = vrot.slane %v789_v61, 4  ;;  %v749_v4 = vpop.permute.xlu0 %748  ;;  %v801_v5 = vpop.permute.xlu1 %800 }
 0x233   : > { %v802_v6 = vsel %vm497_vm0, %v799_v51, %v801_v5  ;;  %v803_v7 = vsel %vm497_vm0, %v801_v5, %v799_v51  ;;  %v629_v5 = vrot.slane %v624_v58, %v1505_v9 }
 0x234   : > { %796 = vst [vmem:[#allocation2 + $0x8] sm:$0xf0] %v792_v2  ;;  %797 = vst [vmem:[#allocation2 + $0x20] sm:$0xf0] %v793_v3  ;;  %v816_v11 = vmul.f32 %v809_v62, %v802_v6  ;;  %v817_v12 = vmul.f32 %v813_v63, %v803_v7  ;;  %v633_v6 = vrot.slane %v624_v58, %v1507_v10 }
 0x236   : > { %818 = vst [vmem:[#allocation2 + $0x40] sm:$0xf] %v816_v11  ;;  %819 = vst [vmem:[#allocation2 + $0x38] sm:$0xf] %v817_v12  ;;  %v723_v16 = vpop.permute.xlu1 %722  ;;  %v691_v19 = vpop.permute.xlu0 %690 }
 0x237   : > { %v724_v17 = vsel %vm413_vm1, %v721_v56, %v723_v16  ;;  %v725_v18 = vsel %vm413_vm1, %v723_v16, %v721_v56 }
 0x238   : > { %v738_v20 = vmul.f32 %v731_v13, %v724_v17  ;;  %v739_v21 = vmul.f32 %v735_v14, %v725_v18  ;;  %v820_v18 = vld [vmem:[#allocation8] sm:$0xf] }
 0x23a   : > { %v742_v25 = vrot.slane %v738_v20, 4  ;;  %v743_v26 = vrot.slane %v739_v21, 4  ;;  %v751_v27 = vpop.permute.xlu1 %750  ;;  %v641_v37 = vpop.permute.xlu0 %640  ;;  %v918_v21 = vcombine.high %v1481_v0, %v1481_v0 }
 0x23b   : > { %v752_v28 = vsel %vm443_vm2, %v749_v4, %v751_v27  ;;  %v753_v29 = vsel %vm443_vm2, %v751_v27, %v749_v4 }
 0x23c   : > { %746 = vst [vmem:[#allocation2 + $0x48] sm:$0xf0] %v742_v25  ;;  %747 = vst [vmem:[#allocation2 + $0x28] sm:$0xf0] %v743_v26  ;;  %v766_v30 = vmul.f32 %v759_v22, %v752_v28  ;;  %v767_v31 = vmul.f32 %v763_v23, %v753_v29 }
 0x23d   : > { %v830_v34 = vld [vmem:[#allocation2 + $0x38] sm:$0xf]  ;;  %v829_v35 = vld [vmem:[#allocation2 + $0x40] sm:$0xf] }
 0x23e   : > { %768 = vst [vmem:[#allocation2 + $0x8] sm:$0xf] %v766_v30  ;;  %769 = vst [vmem:[#allocation2 + $0x20] sm:$0xf] %v767_v31  ;;  %1061 = vmatprep.subr.msk.mxu1 %vm538_vm4, %v830_v34  ;;  %v693_v38 = vpop.permute.xlu1 %692  ;;  %v669_v51 = vpop.permute.xlu0 %668 }
 0x23f   : > { %v694_v39 = vsel %vm381_vm5, %v691_v19, %v693_v38  ;;  %v695_v40 = vsel %vm381_vm5, %v693_v38, %v691_v19  ;;  %1062 = vmatpush1.msk.msra.mxu1 %vm538_vm4, %v829_v35 }
 0x240   : > { %v708_v41 = vmul.f32 %v701_v32, %v695_v40  ;;  %v709_v42 = vmul.f32 %v705_v33, %v694_v39 }
 0x242   : > { %v712_v46 = vrot.slane %v708_v41, 4  ;;  %v713_v47 = vrot.slane %v709_v42, 4  ;;  %v643_v48 = vpop.permute.xlu1 %642  ;;  %v619_v7 = vpop.permute.xlu0 %618 }
 0x243   : > { %v644_v49 = vsel %vm327_vm6, %v641_v37, %v643_v48  ;;  %v645_v50 = vsel %vm327_vm6, %v643_v48, %v641_v37  ;;  %v826_v1 = vld [vmem:[#allocation2 + $0x28] sm:$0xff] }
 0x244   : > { %716 = vst [vmem:[#allocation2 + $0x18] sm:$0xf0] %v712_v46  ;;  %717 = vst [vmem:[#allocation2 + $0x10] sm:$0xf0] %v713_v47  ;;  %v658_v52 = vmul.f32 %v651_v43, %v645_v50  ;;  %v659_v53 = vmul.f32 %v655_v44, %v644_v49  ;;  %v825_v4 = vld [vmem:[#allocation2 + $0x48] sm:$0xff] }
 0x245   : > { %v828_v56 = vld [vmem:[#allocation2 + $0x20] sm:$0xff]  ;;  %v827_v57 = vld [vmem:[#allocation2 + $0x8] sm:$0xff] }
 0x246   : > { %v662_v59 = vrot.slane %v658_v52, 4  ;;  %v663_v60 = vrot.slane %v659_v53, 4  ;;  %870 = vmatprep.subr.mxu1 %v828_v56  ;;  %v671_v61 = vpop.permute.xlu1 %670 }
 0x247   : > { %v672_v62 = vsel %vm357_vm7, %v669_v51, %v671_v61  ;;  %v673_v63 = vsel %vm357_vm7, %v671_v61, %v669_v51  ;;  %871 = vmatpush1.msra.mxu1 %v827_v57 }
 0x248   : > { %666 = vst [vmem:[#allocation2 + $0x30] sm:$0xf0] %v662_v59  ;;  %667 = vst [vmem:[#allocation2] sm:$0xf0] %v663_v60  ;;  %v686_v2 = vmul.f32 %v679_v54, %v673_v63  ;;  %v687_v3 = vmul.f32 %v683_v55, %v672_v62  ;;  %872 = vmatprep.subr.mxu1 %v826_v1 }
 0x249   : > { %873 = vmatpush1.msra.mxu1 %v825_v4 }
 0x24a   : > { %688 = vst [vmem:[#allocation2 + $0x18] sm:$0xf] %v686_v2  ;;  %689 = vst [vmem:[#allocation2 + $0x10] sm:$0xf] %v687_v3  ;;  %v621_v11 = vpop.permute.xlu1 %620 }
 0x24b   : > { %v622_v12 = vsel %vm304_vm8, %v619_v7, %v621_v11  ;;  %v623_v13 = vsel %vm304_vm8, %v621_v11, %v619_v7 }
 0x24c   : > { %v636_v14 = vmul.f32 %v629_v5, %v623_v13  ;;  %v637_v15 = vmul.f32 %v633_v6, %v622_v12 }
 0x24e   : > { %638 = vst [vmem:[#allocation2 + $0x30] sm:$0xf] %v636_v14  ;;  %639 = vst [vmem:[#allocation2] sm:$0xf] %v637_v15 }
 0x24f   : > { %v835_v8 = vpop.permute.xlu0 %834 }
 0x251   : > { %v824_v16 = vld [vmem:[#allocation2 + $0x10] sm:$0xff]  ;;  %v823_v9 = vld [vmem:[#allocation2 + $0x18] sm:$0xff] }
 0x252   : > { %874 = vmatprep.subr.mxu1 %v824_v16 }
 0x253   : > { %875 = vmatpush1.msra.mxu1 %v823_v9 }
 0x255   : > { %v822_v10 = vld [vmem:[#allocation2] sm:$0xff]  ;;  %v821_v17 = vld [vmem:[#allocation2 + $0x30] sm:$0xff] }
 0x256   : > { %876 = vmatprep.subr.mxu1 %v822_v10 }
 0x257   : > { %877 = vmatpush1.msra.mxu1 %v821_v17 }
 0x258   : > { %1063 = vmatmul.mubr.msk.f32.vlgmr.msra.gmra.mxu1 %vm534_vm9, %v820_v18 }
 0x318   : > { %v912_v19 = vpop.f32.mrf.mxu1 }
 0x319   : > { %v913_v20 = vadd.f32 %v912_v19, %v835_v8 }
 0x31a   : > { %v914_v22 = vpop.f32.mrf.mxu1 }
 0x31b   : > { %v915_v23 = vadd.f32 %v914_v22, %v835_v8  ;;  %v920_v24 = vadd.f32 %v913_v20, %v1481_v0 }
 0x31d   : > { %v921_v25 = vadd.f32 %v918_v21, %v915_v23 }
 0x31f   : > { %v924_v26 = vcombine.low %v920_v24, %v921_v25 }
 0x321   : > { %926 = vst [vmem:[%s292_s15] sm:$0xff] %v924_v26 }
 0x322   : > { %1243 = shalt.err (!%p1240_p12)
}
 0x323   : > { %s1244_s1 = scalar_lea.hbm %s940_s13, 128  ;;  %s1248_s7 = scalar_lea.hbm %s1732_s6, 256 }
 0x324   : > { %p1245_p3 = scmp.ne.s32.totalorder %s940_s13, %s1244_s1  ;;  %p1249_p5 = scmp.lt.s32.totalorder %s940_s13, %s1732_s6 }
 0x325   : > { %p1250_p9 = scmp.lt.s32.totalorder %s1248_s7, %s1244_s1 }
 0x326   : > { %p1246_p7 = pnand %p1245_p3, %p1750_p0 }
 0x327   : > { %p1251_p11 = por %p1250_p9, %p1249_p5 }
 0x328   : > { %p1247_p10 = pneg %p1246_p7 }
 0x32a   : > { %p1252_p13 = pnand %p1251_p11, %p1247_p10 }
 0x32c   : > { %1255 = shalt.err (!%p1252_p13)
}
 0x32d   : > { %1081 = dma.vmem_to_hbm [thread:$0]  (%p1750_p0), %s943_s16, 128, %s940_s13, %s928_s30  }
 0x32e PF: > { %s954_s14 = sand.u32 1, %s1286_s21   ;;  %p1751_p1 = scmp.ne.s32.totalorder %s1739_s28, 0 }
 0x32f   : > { %p1752_p2 = scmp.ge.s32.totalorder %s1298_s24, 2  ;;  %s955_s15 = scalar_lea.sflag [#allocation5], %s954_s14 }
 0x331   : > { %p1095_p4 = pnand %p1752_p2, %p1751_p1 }
 0x333   : > { %p1096_p6 = pneg %p1095_p4 }
 0x335   : > { %1281 = dma.done.wait (%p1096_p6), %s955_s15, 128  }
 0x336   : > { %1283 = vsyncadd (%p1096_p6), %s955_s15, 4294967168  ;;  %p20_p8 = scmp.ge.s32.totalorder %s1403_s11, 4   ;;  %s1753_s21 = smov %s1290_s22 }
 0x337   : > { %s1754_s22 = smov %s1294_s23  ;;  %s1755_s23 = smov %s1430_s20 }
 0x338   : > { %s1756_s24 = smov %s1403_s11  ;;  %22 = sbr.rel (!%p20_p8) target bundleno = 8 (0x8), region = 104 }
 0x33d   :  { %960 = vsyncpa [#allocation4], 1 }
 0x33e   :  { %962 = vsyncpa [#allocation4 + $0x1], 1 }
 0x33f   :  { %963 = vsyncpa [#allocation7], 1 }
 0x340   :  { %964 = vsyncpa [#allocation5], 1 }
 0x341   :  { %966 = vsyncpa [#allocation5 + $0x1], 1 }

</bundles_post_ra>
